<compile_context>
chip_gen: v6e
topology: v6e:2x2x1
jax: 0.10.0
libtpu: 0.0.40
codegen_flags: <defaults>
</compile_context>

<pallas_src>
import math

import jax
import jax.numpy as jnp
from jax.experimental import pallas as pl
from jax.experimental.pallas import tpu as pltpu

_LANE = 128                          # last block dim = lane width -> unmasked vst
_TARGET_BLOCK_BYTES = 2 * 1024 * 1024  # ~2 MiB per array per block (mem-bound sweet spot)


def _mul_kernel(x_ref, y_ref, o_ref):
    # Straight rank-matched elementwise multiply on one (block_rows, 128) tile.
    o_ref[...] = x_ref[...] * y_ref[...]


def multiply_pallas(x: jax.Array, y: jax.Array) -> jax.Array:
    """Elementwise multiply with NumPy/PyTorch broadcasting semantics."""
    out_shape = jnp.broadcast_shapes(x.shape, y.shape)
    out_dtype = jnp.result_type(x.dtype, y.dtype)

    total = int(math.prod(out_shape))
    if total == 0:
        # Degenerate empty tensor: nothing to compute.
        return jnp.zeros(out_shape, dtype=out_dtype)

    # Resolve broadcasting / dtype promotion in the wrapper, then flatten to a
    # lane-dense layout.  (broadcast_to is a no-op for already-matching shapes.)
    # TODO(synk): a broadcast operand (e.g. per-channel scale) is materialized
    # at full size here, doubling its HBM read traffic; a fused in-kernel
    # broadcast would avoid that for heavily-broadcast inputs.
    xb = jnp.broadcast_to(x, out_shape).astype(out_dtype).reshape(-1)
    yb = jnp.broadcast_to(y, out_shape).astype(out_dtype).reshape(-1)

    itemsize = jnp.dtype(out_dtype).itemsize
    n_rows = pl.cdiv(total, _LANE)

    # Dtype-aware row-block: ~_TARGET_BLOCK_BYTES per array per block, rounded
    # to a multiple of 8 sublanes.
    max_block_rows = max(8, (_TARGET_BLOCK_BYTES // (_LANE * itemsize)) // 8 * 8)

    if n_rows <= max_block_rows:
        # Single grid step: block == full array, no divisibility constraint.
        block_rows = n_rows
        n_rows_padded = n_rows
    else:
        block_rows = max_block_rows
        n_rows_padded = pl.cdiv(n_rows, block_rows) * block_rows

    padded_total = n_rows_padded * _LANE
    if padded_total != total:
        pad = padded_total - total
        xb = jnp.pad(xb, (0, pad))
        yb = jnp.pad(yb, (0, pad))

    x2 = xb.reshape(n_rows_padded, _LANE)
    y2 = yb.reshape(n_rows_padded, _LANE)

    grid = (n_rows_padded // block_rows,)
    spec = pl.BlockSpec((block_rows, _LANE), lambda i: (i, 0))

    out2 = pl.pallas_call(
        _mul_kernel,
        out_shape=jax.ShapeDtypeStruct((n_rows_padded, _LANE), out_dtype),
        grid_spec=pltpu.PrefetchScalarGridSpec(
            num_scalar_prefetch=0,
            grid=grid,
            in_specs=[spec, spec],
            out_specs=spec,
        ),
        compiler_params=pltpu.CompilerParams(
            dimension_semantics=("parallel",),
            vmem_limit_bytes=32 * 1024 * 1024,
        ),
    )(x2, y2)

    if padded_total != total:
        out_flat = out2.reshape(-1)[:total]
    else:
        out_flat = out2.reshape(-1)
    return out_flat.reshape(out_shape)


if __name__ == "__main__":
    key = jax.random.PRNGKey(0)
    kx, ky, kz = jax.random.split(key, 3)

    # Small NCHW-like inputs: batch=2, channels=4, spatial=16x16.
    x = jax.random.normal(kx, (2, 4, 16, 16), dtype=jnp.float32)
    y = jax.random.normal(ky, (2, 4, 16, 16), dtype=jnp.float32)

    out = multiply_pallas(x, y)
    jax.block_until_ready(out)
    ref = x * y
    assert out.shape == ref.shape and out.dtype == ref.dtype
    assert bool(jnp.allclose(out, ref, rtol=1e-6, atol=1e-6))

    # Also exercise the broadcasting path (per-channel scale).
    z = jax.random.normal(kz, (1, 4, 1, 1), dtype=jnp.float32)
    out_b = multiply_pallas(x, z)
    jax.block_until_ready(out_b)
    assert bool(jnp.allclose(out_b, x * z, rtol=1e-6, atol=1e-6))

    print("KERNEL_OK")
</pallas_src>

<mosaic_0001>
module attributes {stable_mosaic.version = 11 : i64} {
  func.func @_mul_kernel(%arg0: i32, %arg1: memref<16x128xf32, #tpu.memory_space<vmem>>, %arg2: memref<16x128xf32, #tpu.memory_space<vmem>>, %arg3: memref<16x128xf32, #tpu.memory_space<vmem>>) attributes {dimension_semantics = [#tpu.dimension_semantics<parallel>], iteration_bounds = array<i64: 1>, scalar_prefetch = 0 : i64, scratch_operands = 0 : i64, tpu.core_type = #tpu.core_type<tc>, window_params = [{transform_indices = @transform_0, window_bounds = array<i64: 16, 128>}, {transform_indices = @transform_1, window_bounds = array<i64: 16, 128>}, {transform_indices = @transform_2, window_bounds = array<i64: 16, 128>}]} {
    %c0 = arith.constant 0 : index
    %c0_0 = arith.constant 0 : index
    %0 = vector.load %arg1[%c0, %c0_0] : memref<16x128xf32, #tpu.memory_space<vmem>>, vector<16x128xf32>
    %c0_1 = arith.constant 0 : index
    %c0_2 = arith.constant 0 : index
    %1 = vector.load %arg2[%c0_1, %c0_2] : memref<16x128xf32, #tpu.memory_space<vmem>>, vector<16x128xf32>
    %2 = arith.mulf %0, %1 : vector<16x128xf32>
    %c0_3 = arith.constant 0 : index
    %c0_4 = arith.constant 0 : index
    %3 = vector.load %arg3[%c0_3, %c0_4] : memref<16x128xf32, #tpu.memory_space<vmem>>, vector<16x128xf32>
    tpu.vector_store %arg3[%c0_3, %c0_4], %2 {strides = array<i32>} : memref<16x128xf32, #tpu.memory_space<vmem>>, vector<16x128xf32>,
    return
  }
  func.func @transform_0(%arg0: i32) -> (i32, i32) {
    %c0_i32 = arith.constant 0 : i32
    %c0_i32_0 = arith.constant 0 : i32
    return %arg0, %c0_i32 : i32, i32
  }
  func.func @transform_1(%arg0: i32) -> (i32, i32) {
    %c0_i32 = arith.constant 0 : i32
    %c0_i32_0 = arith.constant 0 : i32
    return %arg0, %c0_i32 : i32, i32
  }
  func.func @transform_2(%arg0: i32) -> (i32, i32) {
    %c0_i32 = arith.constant 0 : i32
    %c0_i32_0 = arith.constant 0 : i32
    return %arg0, %c0_i32 : i32, i32
  }
}

</mosaic_0001>

<bundles_post_ra>
// kernel: tpu_custom_call.1
= control target key start
LH: loop header
LB: loop body
LE: loop exit
PB: predicated region body
PF: predicated region fallthrough
CT: control target
= control target key end

     0   :  { %7 = vsyncpa [#allocation3], 0  ;;  %s175_s0 = inlined_call_operand.hbm [shape: f32[16,128], index: 0, kind: input, shape index: {}]   ;;  %s176_s1 = inlined_call_operand.hbm [shape: f32[16,128], index: 1, kind: input, shape index: {}]   ;;  %s177_s2 = inlined_call_operand.hbm [shape: f32[16,128], index: 2, kind: output, shape index: {}]  }
   0x1   :  { %8 = vsyncpa [#allocation6], 0 }
   0x2   :  { %9 = vsyncpa [#allocation4], 0  ;;  %s137_s9 = smov [#allocation2]  }
   0x3   :  { %s15_s10 = sshll.u32 %s137_s9, 4  ;;  %s16_s10 = int_to_ptr.vmem [resolvable:$true] %s15_s10 }
   0x4   :  { %s79_s11 = scalar_lea.vmem %s16_s10, 256  ;;  %p84_p1 = scmp.lt.s32.totalorder %s16_s10, %s16_s10 }
   0x5   :  { %p80_p0 = scmp.ne.s32.totalorder %s16_s10, %s79_s11  ;;  %p85_p2 = scmp.lt.s32.totalorder %s79_s11, %s79_s11 }
   0x7   :  { %p86_p3 = por %p85_p2, %p84_p1 }
   0x9   :  { %p87_p4 = pnand %p86_p3, %p80_p0 }
   0xb   :  { %90 = shalt.err (!%p87_p4)
}
   0xc   :  { %s138_s12 = smov 128   ;;  %s139_s13 = smov 8  }
   0xd   :  { %21 = dma.hbm_to_vmem [thread:$0]  %s175_s0, 256, %s16_s10, [#allocation3], %s138_s12, %s138_s12, %s139_s13  }
   0xe   :  { %s140_s16 = smov [#allocation5]  }
   0xf   :  { %s27_s17 = sshll.u32 %s140_s16, 4  ;;  %s28_s17 = int_to_ptr.vmem [resolvable:$true] %s27_s17 }
  0x10   :  { %s99_s18 = scalar_lea.vmem %s28_s17, 256  ;;  %p104_p6 = scmp.lt.s32.totalorder %s28_s17, %s28_s17 }
  0x11   :  { %p100_p5 = scmp.ne.s32.totalorder %s28_s17, %s99_s18  ;;  %p105_p7 = scmp.lt.s32.totalorder %s99_s18, %s99_s18 }
  0x13   :  { %p106_p8 = por %p105_p7, %p104_p6 }
  0x15   :  { %p107_p9 = pnand %p106_p8, %p100_p5 }
  0x17   :  { %110 = shalt.err (!%p107_p9)
}
  0x18   :  { %33 = dma.hbm_to_vmem [thread:$0]  %s176_s1, 256, %s28_s17, [#allocation6], %s138_s12, %s138_s12, %s139_s13  }
  0x19   :  { %131 = dma.done.wait [#allocation3], 256  }
  0x1a   :  { %132 = vsyncadd [#allocation3], 4294967040 }
  0x1b   :  { %133 = dma.done.wait [#allocation6], 256  }
  0x1c   :  { %134 = vsyncadd [#allocation6], 4294967040  ;;  %s141_s0 = smov [#allocation7]   ;;  %v40_v0 = vld [vmem:[#allocation2] sm:$0xff]  ;;  %v42_v1 = vld [vmem:[#allocation5] sm:$0xff] }
  0x1d   :  { %s53_s21 = sshll.u32 %s141_s0, 4  ;;  %v41_v2 = vld [vmem:[#allocation2 + $0x8] sm:$0xff]  ;;  %v44_v3 = vmul.f32 %v42_v1, %v40_v0  ;;  %v43_v4 = vld [vmem:[#allocation5 + $0x8] sm:$0xff]  ;;  %s54_s21 = int_to_ptr.vmem [resolvable:$true] %s53_s21 }
  0x1e   :  { %v45_v5 = vmul.f32 %v43_v4, %v41_v2  ;;  %s111_s22 = scalar_lea.vmem %s54_s21, 256  ;;  %p116_p11 = scmp.lt.s32.totalorder %s54_s21, %s54_s21 }
  0x1f   :  { %46 = vst [vmem:[#allocation7] sm:$0xff] %v44_v3  ;;  %p112_p10 = scmp.ne.s32.totalorder %s54_s21, %s111_s22  ;;  %p117_p12 = scmp.lt.s32.totalorder %s111_s22, %s111_s22 }
  0x20   :  { %47 = vst [vmem:[#allocation7 + $0x8] sm:$0xff] %v45_v5 }
  0x21   :  { %p118_p13 = por %p117_p12, %p116_p11 }
  0x23   :  { %p119_p0 = pnand %p118_p13, %p112_p10 }
  0x25   :  { %122 = shalt.err (!%p119_p0)
}
  0x26   :  { %59 = dma.vmem_to_hbm [thread:$0]  %s54_s21, 256, %s177_s2, [#allocation4], %s138_s12, %s138_s12, %s139_s13  }
  0x27   :  { %135 = dma.done.wait [#allocation4], 256  }
  0x28   :  { %136 = vsyncadd [#allocation4], 4294967040 }
  0x29   :  { %63 = vsyncpa [#allocation3], 1 }
  0x2a   :  { %64 = vsyncpa [#allocation6], 1 }
  0x2b   :  { %65 = vsyncpa [#allocation4], 1 }

</bundles_post_ra>
